<compile_context>
chip_gen: v7x
topology: tpu7x:2x2x1
jax: 0.10.0
libtpu: 0.0.40
codegen_flags: <defaults>
</compile_context>

<pallas_src>
import jax
import jax.numpy as jnp
from jax.experimental import pallas as pl
from jax.experimental.pallas import tpu as pltpu


def _predictor_kernel(scalars_ref, x_ref, w1_ref, b1_ref, w2t_ref, o_ref):
    # scalars (SMEM): [alpha, b2]
    # x: (TB, D)   w1: (D, H)   b1: (1, H)   w2t: (1, H)   o: (TB, 1)
    alpha = scalars_ref[0]
    b2 = scalars_ref[1]

    # Linear 1 on the MXU, f32 accumulation.
    h = jnp.dot(x_ref[...], w1_ref[...], preferred_element_type=jnp.float32)
    h = h + b1_ref[...].astype(jnp.float32)

    # PReLU with a single shared parameter alpha.
    h = jnp.where(h >= 0.0, h, alpha * h)

    # Dropout(0.2): identity in eval mode.

    # Linear 2 (output width 1): VPU multiply + lane reduction (XLU slot)
    # instead of a wasted N=1 MXU pass + result-FIFO drain.
    out = jnp.sum(h * w2t_ref[...].astype(jnp.float32), axis=-1, keepdims=True) + b2
    o_ref[...] = out.astype(o_ref.dtype)


def predictor_regressor(x, w1, b1, w2, b2, alpha, *, block_b=512,
                        matmul_dtype=None):
    """Forward pass of PredictorRegressor.

    x: (B, D), w1: (D, 2D), b1: (1, 2D), w2: (2D, 1), b2: (1, 1),
    alpha: (1,) PReLU parameter. Returns (B, 1) f32.
    """
    B, D = x.shape
    H = 2 * D
    assert w1.shape == (D, H) and b1.shape == (1, H)
    assert w2.shape == (H, 1) and b2.shape == (1, 1)

    # Scalars (PReLU alpha, output bias) live in SMEM.
    scalars = jnp.concatenate(
        [alpha.reshape(-1).astype(jnp.float32), b2.reshape(-1).astype(jnp.float32)]
    )

    # Second linear weight as a (1, H) row vector -> lane-wise reduce in kernel.
    w2t = jnp.transpose(w2)  # (1, H)

    # Optional reduced-precision matmul operands (f32 accumulation kept).
    if matmul_dtype is not None:
        x = x.astype(matmul_dtype)
        w1 = w1.astype(matmul_dtype)

    # Batch tile: big as allowed, multiple of 8 (sublane) unless B < 8.
    if B >= 8:
        tb = min(block_b, B)
        tb = max(8, (tb // 8) * 8)
    else:
        tb = B
    grid = (pl.cdiv(B, tb),)

    # Explicit VMEM budget: double-buffered x/out tiles + (worst-case 2x
    # buffered) resident params + headroom. Capped under v7x's 64 MiB.
    itemsize = jnp.dtype(x.dtype).itemsize
    vmem_bytes = (
        2 * (tb * D) * itemsize            # x tile, double buffered
        + 2 * tb * 4                       # out tile, double buffered
        + 2 * (D * H) * itemsize           # resident w1
        + 2 * (2 * H) * 4                  # resident b1, w2^T
        + (4 << 20)                        # scratch / layout headroom
    )
    vmem_bytes = int(min(vmem_bytes, 60 << 20))

    grid_spec = pltpu.PrefetchScalarGridSpec(
        num_scalar_prefetch=0,
        grid=grid,
        in_specs=[
            pl.BlockSpec(memory_space=pltpu.MemorySpace.SMEM),  # [alpha, b2]
            pl.BlockSpec((tb, D), lambda i: (i, 0)),            # x tile (pipelined)
            pl.BlockSpec((D, H), lambda i: (0, 0)),             # w1 (resident)
            pl.BlockSpec((1, H), lambda i: (0, 0)),             # b1 (resident)
            pl.BlockSpec((1, H), lambda i: (0, 0)),             # w2^T (resident)
        ],
        out_specs=pl.BlockSpec((tb, 1), lambda i: (i, 0)),
    )

    return pl.pallas_call(
        _predictor_kernel,
        out_shape=jax.ShapeDtypeStruct((B, 1), jnp.float32),
        grid_spec=grid_spec,
        compiler_params=pltpu.CompilerParams(
            dimension_semantics=("parallel",),   # megacore sharding on v7x
            vmem_limit_bytes=vmem_bytes,
        ),
    )(scalars, x, w1, b1, w2t)


def _reference(x, w1, b1, w2, b2, alpha):
    h = x @ w1 + b1
    h = jnp.where(h >= 0.0, h, alpha[0] * h)
    return h @ w2 + b2


if __name__ == "__main__":
    key = jax.random.PRNGKey(0)
    k_x, k_w1, k_b1, k_w2, k_b2 = jax.random.split(key, 5)

    B = 8          # batch
    D = 32         # input_dim
    H = 2 * D      # hidden (input_dim * 2)

    # Example input
    x = jax.random.normal(k_x, (B, D), dtype=jnp.float32)

    # Deterministic parameter init (PyTorch-style uniform bounds).
    bound1 = 1.0 / (D ** 0.5)
    w1 = jax.random.uniform(k_w1, (D, H), jnp.float32, -bound1, bound1)
    b1 = jax.random.uniform(k_b1, (1, H), jnp.float32, -bound1, bound1)

    bound2 = 1.0 / (H ** 0.5)
    w2 = jax.random.uniform(k_w2, (H, 1), jnp.float32, -bound2, bound2)
    b2 = jax.random.uniform(k_b2, (1, 1), jnp.float32, -bound2, bound2)

    # PReLU default init in PyTorch is 0.25
    alpha = jnp.array([0.25], dtype=jnp.float32)

    out = predictor_regressor(x, w1, b1, w2, b2, alpha)
    out = jax.block_until_ready(out)

    ref = _reference(x, w1, b1, w2, b2, alpha)
    assert out.shape == (B, 1), out.shape
    assert jnp.allclose(out, ref, atol=1e-5, rtol=1e-5), "mismatch vs reference"

    print("KERNEL_OK")
</pallas_src>

<mosaic_0001>
module attributes {stable_mosaic.version = 11 : i64} {
  func.func @_predictor_kernel(%arg0: i32, %arg1: memref<2xf32, #tpu.memory_space<smem>>, %arg2: memref<8x32xf32, #tpu.memory_space<vmem>>, %arg3: memref<32x64xf32, #tpu.memory_space<vmem>>, %arg4: memref<1x64xf32, #tpu.memory_space<vmem>>, %arg5: memref<1x64xf32, #tpu.memory_space<vmem>>, %arg6: memref<8x1xf32, #tpu.memory_space<vmem>>) attributes {dimension_semantics = [#tpu.dimension_semantics<parallel>], iteration_bounds = array<i64: 1>, scalar_prefetch = 0 : i64, scratch_operands = 0 : i64, tpu.core_type = #tpu.core_type<tc>, window_params = [{transform_indices = @transform_0, window_bounds = array<i64: 2>}, {transform_indices = @transform_1, window_bounds = array<i64: 8, 32>}, {pipeline_mode = #tpu.pipeline_mode<synchronous>, transform_indices = @transform_2, window_bounds = array<i64: 32, 64>}, {pipeline_mode = #tpu.pipeline_mode<synchronous>, transform_indices = @transform_3, window_bounds = array<i64: 1, 64>}, {pipeline_mode = #tpu.pipeline_mode<synchronous>, transform_indices = @transform_4, window_bounds = array<i64: 1, 64>}, {transform_indices = @transform_5, window_bounds = array<i64: 8, 1>}]} {
    %c0 = arith.constant 0 : index
    %0 = memref.load %arg1[%c0] : memref<2xf32, #tpu.memory_space<smem>>
    %c1 = arith.constant 1 : index
    %1 = memref.load %arg1[%c1] : memref<2xf32, #tpu.memory_space<smem>>
    %c0_0 = arith.constant 0 : index
    %c0_1 = arith.constant 0 : index
    %2 = vector.load %arg2[%c0_0, %c0_1] : memref<8x32xf32, #tpu.memory_space<vmem>>, vector<8x32xf32>
    %c0_2 = arith.constant 0 : index
    %c0_3 = arith.constant 0 : index
    %3 = vector.load %arg3[%c0_2, %c0_3] : memref<32x64xf32, #tpu.memory_space<vmem>>, vector<32x64xf32>
    %cst = arith.constant dense<0.000000e+00> : vector<8x64xf32>
    %4 = tpu.matmul %2, %3, %cst {dimension_numbers = #tpu.dot_dimension_numbers<[1], [0], [0], [1], [0, 0, 1, 1], [], []>} : vector<8x32xf32>, vector<32x64xf32>, vector<8x64xf32> -> vector<8x64xf32>
    %c0_4 = arith.constant 0 : index
    %c0_5 = arith.constant 0 : index
    %5 = vector.load %arg4[%c0_4, %c0_5] : memref<1x64xf32, #tpu.memory_space<vmem>>, vector<1x64xf32>
    %6 = vector.broadcast %5 : vector<1x64xf32> to vector<8x64xf32>
    %7 = arith.addf %4, %6 : vector<8x64xf32>
    %cst_6 = arith.constant 0.000000e+00 : f32
    %8 = vector.broadcast %cst_6 : f32 to vector<8x64xf32>
    %9 = arith.cmpf oge, %7, %8 : vector<8x64xf32>
    %10 = vector.broadcast %0 : f32 to vector<8x64xf32>
    %11 = arith.mulf %10, %7 : vector<8x64xf32>
    %12 = arith.select %9, %7, %11 : vector<8x64xi1>, vector<8x64xf32>
    %c0_7 = arith.constant 0 : index
    %c0_8 = arith.constant 0 : index
    %13 = vector.load %arg5[%c0_7, %c0_8] : memref<1x64xf32, #tpu.memory_space<vmem>>, vector<1x64xf32>
    %14 = vector.broadcast %13 : vector<1x64xf32> to vector<8x64xf32>
    %15 = arith.mulf %12, %14 : vector<8x64xf32>
    %cst_9 = arith.constant dense<0.000000e+00> : vector<8xf32>
    %16 = vector.multi_reduction <add>, %15, %cst_9 [1] : vector<8x64xf32> to vector<8xf32>
    %17 = vector.shape_cast %16 : vector<8xf32> to vector<8x1xf32>
    %18 = vector.broadcast %1 : f32 to vector<8x1xf32>
    %19 = arith.addf %17, %18 : vector<8x1xf32>
    %c0_10 = arith.constant 0 : index
    %c0_11 = arith.constant 0 : index
    %20 = vector.load %arg6[%c0_10, %c0_11] : memref<8x1xf32, #tpu.memory_space<vmem>>, vector<8x1xf32>
    tpu.vector_store %arg6[%c0_10, %c0_11], %19 {strides = array<i32>} : memref<8x1xf32, #tpu.memory_space<vmem>>, vector<8x1xf32>,
    return
  }
  func.func @transform_0(%arg0: i32) -> i32 {
    %c0_i32 = arith.constant 0 : i32
    %c0_i32_0 = arith.constant 0 : i32
    return %c0_i32 : i32
  }
  func.func @transform_1(%arg0: i32) -> (i32, i32) {
    %c0_i32 = arith.constant 0 : i32
    %c0_i32_0 = arith.constant 0 : i32
    return %arg0, %c0_i32 : i32, i32
  }
  func.func @transform_2(%arg0: i32) -> (i32, i32) {
    %c0_i32 = arith.constant 0 : i32
    %c0_i32_0 = arith.constant 0 : i32
    %c0_i32_1 = arith.constant 0 : i32
    return %c0_i32, %c0_i32_0 : i32, i32
  }
  func.func @transform_3(%arg0: i32) -> (i32, i32) {
    %c0_i32 = arith.constant 0 : i32
    %c0_i32_0 = arith.constant 0 : i32
    %c0_i32_1 = arith.constant 0 : i32
    return %c0_i32, %c0_i32_0 : i32, i32
  }
  func.func @transform_4(%arg0: i32) -> (i32, i32) {
    %c0_i32 = arith.constant 0 : i32
    %c0_i32_0 = arith.constant 0 : i32
    %c0_i32_1 = arith.constant 0 : i32
    return %c0_i32, %c0_i32_0 : i32, i32
  }
  func.func @transform_5(%arg0: i32) -> (i32, i32) {
    %c0_i32 = arith.constant 0 : i32
    %c0_i32_0 = arith.constant 0 : i32
    return %arg0, %c0_i32 : i32, i32
  }
}

</mosaic_0001>

<bundles_post_ra>
// kernel: tpu_custom_call.1
= control target key start
LH: loop header
LB: loop body
LE: loop exit
PB: predicated region body
PF: predicated region fallthrough
CT: control target
= control target key end

     0   :  { %10 = vsyncpa [#allocation4], 0  ;;  %s349_s0 = inlined_call_operand.hbm [shape: f32[2], index: 0, kind: input, shape index: {}]   ;;  %s350_s1 = inlined_call_operand.hbm [shape: f32[8,32], index: 1, kind: input, shape index: {}]   ;;  %s351_s2 = inlined_call_operand.hbm [shape: f32[32,64], index: 2, kind: input, shape index: {}]   ;;  %s352_s3 = inlined_call_operand.vmem [shape: f32[1,64], index: 3, kind: input, shape index: {}]   ;;  %s353_s4 = inlined_call_operand.vmem [shape: f32[1,64], index: 4, kind: input, shape index: {}]   ;;  %s354_s5 = inlined_call_operand.vmem [shape: f32[8,1], index: 5, kind: output, shape index: {}]  }
   0x1   :  { %11 = vsyncpa [#allocation3], 0 }
   0x2   :  { %12 = vsyncpa [#allocation7], 0  ;;  %s206_s20 = scalar_lea.hbm %s349_s0, 16 }
   0x3   :  { %p207_p0 = scmp.ne.s32.totalorder %s349_s0, %s206_s20  ;;  %p210_p1 = scmp.lt.u32.totalorder %s206_s20, %s349_s0 }
   0x5   :  { %p212_p2 = pnand %p210_p1, %p207_p0 }
   0x7   :  { %215 = shalt.err (!%p212_p2)
}
   0x8   :  { %s266_s25 = smov [#allocation2]   ;;  %s267_s28 = smov [#allocation5]  }
   0x9   :  { %20 = dma.hbm_to_smem %s349_s0, 16, %s266_s25, [#allocation4]  }
   0xa   :  { %s27_s29 = sshll.u32 %s267_s28, 4  ;;  %s268_s30 = smov [#allocation6]   ;;  %s28_s29 = int_to_ptr.vmem [resolvable:$true] %s27_s29 }
   0xb   :  { %s36_s6 = sshll.u32 %s268_s30, 4  ;;  %s216_s9 = scalar_lea.hbm %s350_s1, 128  ;;  %s37_s6 = int_to_ptr.vmem [resolvable:$true] %s36_s6 }
   0xc   :  { %p217_p3 = scmp.ne.s32.totalorder %s350_s1, %s216_s9  ;;  %p220_p4 = scmp.lt.u32.totalorder %s216_s9, %s350_s1 }
   0xe   :  { %p222_p5 = pnand %p220_p4, %p217_p3 }
  0x10   :  { %225 = shalt.err (!%p222_p5)
}
  0x11   :  { %s226_s0 = scalar_lea.vmem %s28_s29, 128  ;;  %p231_p7 = scmp.lt.s32.totalorder %s28_s29, %s28_s29 }
  0x12   :  { %p227_p6 = scmp.ne.s32.totalorder %s28_s29, %s226_s0  ;;  %p232_p8 = scmp.lt.s32.totalorder %s226_s0, %s226_s0 }
  0x14   :  { %p233_p9 = por %p232_p8, %p231_p7 }
  0x16   :  { %p234_p10 = pnand %p233_p9, %p227_p6 }
  0x18   :  { %237 = shalt.err (!%p234_p10)
}
  0x19   :  { %30 = dma.hbm_to_vmem [thread:$0]  %s350_s1, 128, %s28_s29, [#allocation3]  }
  0x1a   :  { %s238_s18 = scalar_lea.hbm %s351_s2, 512 }
  0x1b   :  { %p239_p11 = scmp.ne.s32.totalorder %s351_s2, %s238_s18  ;;  %p242_p12 = scmp.lt.u32.totalorder %s238_s18, %s351_s2 }
  0x1d   :  { %p244_p13 = pnand %p242_p12, %p239_p11 }
  0x1f   :  { %247 = shalt.err (!%p244_p13)
}
  0x20   :  { %s248_s23 = scalar_lea.vmem %s37_s6, 512  ;;  %p253_p1 = scmp.lt.s32.totalorder %s37_s6, %s37_s6 }
  0x21   :  { %p249_p0 = scmp.ne.s32.totalorder %s37_s6, %s248_s23  ;;  %p254_p2 = scmp.lt.s32.totalorder %s248_s23, %s248_s23 }
  0x23   :  { %p255_p3 = por %p254_p2, %p253_p1 }
  0x25   :  { %p256_p4 = pnand %p255_p3, %p249_p0 }
  0x27   :  { %259 = shalt.err (!%p256_p4)
}
  0x28   :  { %s269_s1 = smov 128   ;;  %s270_s24 = smov 8  }
  0x29   :  { %42 = dma.hbm_to_vmem [thread:$0]  %s351_s2, 512, %s37_s6, [#allocation7], %s269_s1, %s269_s1, %s270_s24  }
  0x2a   :  { %260 = dma.done.wait [#allocation4], 16  }
  0x2b   :  { %261 = vsyncadd [#allocation4], 4294967280 }
  0x2c   :  { %262 = dma.done.wait [#allocation3], 128  }
  0x2d   :  { %263 = vsyncadd [#allocation3], 4294967168 }
  0x2e   :  { %264 = dma.done.wait [#allocation7], 512  }
  0x2f   :  { %265 = vsyncadd [#allocation7], 4294966784 }
  0x30   :  { %56 = sfence }
  0x31   :  { %v60_v0 = vld [vmem:[#allocation6] sm:$0xff]  ;;  %v61_v1 = vld [vmem:[#allocation6 + $0x8] sm:$0xff]  ;;  %v62_v2 = vld [vmem:[#allocation6 + $0x10] sm:$0xff]  ;;  %v271_v3 = vmov 0.0|0.0   ;;  %vm272_vm0 = vmmov 0   ;;  %v273_v6 = vmov 0.0  }
  0x32   :  { %192 = vmatprep.subr.bf16.mxu0 %v271_v3  ;;  %v193_v4 = vpack.c.bf16 %v61_v1, %v60_v0  ;;  %v63_v5 = vld [vmem:[#allocation6 + $0x18] sm:$0xff]  ;;  %189 = vmatprep.mubr.msk.f32.mxu0 %vm272_vm0, %v273_v6  ;;  %vm71_vm1 = vcmask 261120   ;;  %s57_s2 = sld [smem:[#allocation2]]  ;;  %vm157_vm3 = vcmask 523264   ;;  %s172_s6 = sld [smem:[#allocation2 + $0x1]]  ;;  %vm163_vm4 = vcmask 7168  }
  0x33   :  { %v196_v7 = vpack.c.bf16 %v63_v5, %v62_v2  ;;  %v59_v8 = vld [vmem:[#allocation5] sm:$0xff] }
  0x34   :  { %194 = vmatpush3.bf16.msra.mxu0 %v193_v4  ;;  %v173_v9 = vld [vmem:[%s352_s3] ss:$0 sm:$0xff] }
  0x35   :  { %195 = vmatprep.subr.bf16.mxu0 %v271_v3  ;;  %v175_v15 = vld [vmem:[%s353_s4] ss:$0 sm:$0xff] }
  0x38   :  { %197 = vmatpush3.bf16.msra.mxu0 %v196_v7  ;;  %v146_v11 = vstv %s57_s2  ;;  %v161_v19 = vstv %s172_s6 }
  0x3b   :  { %190 = vmatmul.mubr.msk.f32.vlgmr.msra.gmra.mrb[0].mxu0 %vm71_vm1, %v59_v8 }
 0x10e   :  { %v141_v10 = vpop.f32.mrb[0].mxu0 }
 0x10f   :  { %v142_v12 = vadd.f32 %v173_v9, %v141_v10  ;;  %v191_v13 = vpop.f32.mrb[1].mxu0 }
 0x111   :  { %v147_v14 = vmul.f32 %v146_v11, %v142_v12  ;;  %vm145_vm2 = vcmp.ge.f32.partialorder %v142_v12, 0.0 }
 0x113   :  { %v148_v16 = vsel %vm145_vm2, %v142_v12, %v147_v14 }
 0x114   :  { %v156_v17 = vmul.f32 %v175_v15, %v148_v16 }
 0x116   :  { %v158_v18 = vsel %vm157_vm3, %v156_v17, 0.0 }
 0x117   :  { %159 = vadd.xlane.f32.xlu0 %v158_v18 }
 0x1a4   :  { %v160_v20 = vpop.xlane.xlu0 %159 }
 0x1a5   :  { %v162_v21 = vadd.f32 %v161_v19, %v160_v20 }
 0x1a7   :  { %164 = vst.msk [vmem:[%s354_s5] sm:$0xff] %vm163_vm4, %v162_v21 }
 0x1a8   :  { %169 = vsyncpa [#allocation3], 1 }
 0x1a9   :  { %170 = vsyncpa [#allocation7], 1 }
 0x1aa   :  { %171 = vsyncpa [#allocation4], 1 }

</bundles_post_ra>
